<compile_context>
chip_gen: v7x
topology: tpu7x:2x2x1
jax: 0.10.0
libtpu: 0.0.40
codegen_flags: <defaults>
</compile_context>

<pallas_src>
import functools

import jax
import jax.numpy as jnp
from jax import lax
from jax.experimental import pallas as pl
from jax.experimental.pallas import tpu as pltpu


# -----------------------------------------------------------------------------
# Kernel
# -----------------------------------------------------------------------------
def rnn_classifier_kernel(
    xcat_ref,    # (L*B, 2F)   row (t*B+b) = [x[t, b, :], x[L-1-t, b, :]]
    wxc_ref,     # (2F, 8H)    fused fwd/rev input weights, gate order [i,f,o,g]
    whc_ref,     # (2H, 8H)    block-diagonal fused recurrent weights
    biasc_ref,   # (1, 8H)     fused biases (b_ih + b_hh per direction)
    wcomb_ref,   # (B*2H, 2)   head: linear(2H->2) folded into final_layer, b-major
    bout_ref,    # (1, 2)      folded head bias
    out_ref,     # (L, 2)
    *, L, B, H,
):
    H2 = 2 * H

    # ---- Hoisted input projection: one MXU matmul for all timesteps, both
    # directions.  Kept as a register-resident value (~L*B*8H*4B = 32 KB);
    # per-step slices are off the serial chain (no dependence on h) so the
    # scheduler can extract them ahead of each step.
    gx = (jnp.dot(xcat_ref[...], wxc_ref[...],
                  preferred_element_type=jnp.float32)
          + biasc_ref[...])                              # (L*B, 8H)

    whc = whc_ref[...]                                   # (2H, 8H)

    # ---- Fused bidirectional recurrence, fully unrolled (L is static & small).
    h = jnp.zeros((B, H2), jnp.float32)                  # [h_fwd | h_rev]
    c = jnp.zeros((B, H2), jnp.float32)
    h_fwd = [None] * L
    h_rev = [None] * L
    for s in range(L):
        gates = gx[s * B:(s + 1) * B, :] + jnp.dot(
            h, whc, preferred_element_type=jnp.float32)  # (B, 8H)
        # permuted gate layout: [ i_f i_r | f_f f_r | o_f o_r | g_f g_r ]
        # sigmoid as tanh form: single EUP op + cheap VPU ops, pipelines with
        # the existing tanh(g)/tanh(c) on the per-step serial chain.
        sig = 0.5 * jnp.tanh(0.5 * gates[:, :3 * H2]) + 0.5
        i_g = sig[:, 0:H2]
        f_g = sig[:, H2:2 * H2]
        o_g = sig[:, 2 * H2:3 * H2]
        g_g = jnp.tanh(gates[:, 3 * H2:])
        c = f_g * c + i_g * g_g
        h = o_g * jnp.tanh(c)
        h_fwd[s] = h[:, 0:H]                             # fwd output at time s
        h_rev[L - 1 - s] = h[:, H:H2]                    # rev output at time L-1-s

    # ---- Epilogue: assemble BiLSTM output in registers (b-major flatten of
    # (L, B, 2H) -> (L, B*2H)), then a single head matmul + folded bias.
    hcat = jnp.stack(
        [jnp.concatenate([h_fwd[t], h_rev[t]], axis=1) for t in range(L)],
        axis=0)                                          # (L, B, 2H)
    hflat = hcat.reshape(L, B * H2)                      # (L, B*2H)
    out_ref[...] = (jnp.dot(hflat, wcomb_ref[...],
                            preferred_element_type=jnp.float32)
                    + bout_ref[...])


# -----------------------------------------------------------------------------
# Wrapper (weight fusion / permutation done here, once)
# -----------------------------------------------------------------------------
@jax.jit
def rnn_channel_classifier(x, params):
    """x: (L, B, F) float32.  params: dict of PyTorch-shaped weights."""
    L, B, F = x.shape
    H = params["W_hh_f"].shape[1]
    order = (0, 1, 3, 2)   # torch gate rows [i, f, g, o] -> [i, f, o, g]

    def gate_rows(W):      # (4H, X) -> list of 4 blocks (H, X) in [i, f, o, g]
        return [W[g * H:(g + 1) * H] for g in order]

    wih_f = gate_rows(params["W_ih_f"])
    wih_r = gate_rows(params["W_ih_r"])
    whh_f = gate_rows(params["W_hh_f"])
    whh_r = gate_rows(params["W_hh_r"])
    bsum_f = params["b_ih_f"] + params["b_hh_f"]
    bsum_r = params["b_ih_r"] + params["b_hh_r"]

    zF = jnp.zeros((F, H), jnp.float32)
    zH = jnp.zeros((H, H), jnp.float32)

    # Fused input-projection weight (2F, 8H): rows 0:F act on x[t], rows F:2F on
    # x[L-1-t]; column layout = gate-major [i,f,o,g], fwd/rev interleaved per gate.
    wx_cols, wh_cols, b_cols = [], [], []
    for gi in range(4):
        wx_cols.append(jnp.concatenate([wih_f[gi].T, zF], axis=0))   # fwd cols
        wx_cols.append(jnp.concatenate([zF, wih_r[gi].T], axis=0))   # rev cols
        wh_cols.append(jnp.concatenate([whh_f[gi].T, zH], axis=0))   # block-diag
        wh_cols.append(jnp.concatenate([zH, whh_r[gi].T], axis=0))
        g = order[gi]
        b_cols.append(bsum_f[g * H:(g + 1) * H])
        b_cols.append(bsum_r[g * H:(g + 1) * H])
    wxc = jnp.concatenate(wx_cols, axis=1)              # (2F, 8H)
    whc = jnp.concatenate(wh_cols, axis=1)              # (2H, 8H)
    biasc = jnp.concatenate(b_cols)[None, :]            # (1, 8H)

    # Pre-flattened inputs: [x[t,b,:], x[L-1-t,b,:]] per row, both dirs at once.
    xcat = jnp.concatenate(
        [x.reshape(L * B, F), x[::-1].reshape(L * B, F)], axis=1)    # (L*B, 2F)

    # Head fusion: out[l,k] = hflat[l,:] @ wcomb_flat[:,k] + bias_out[k]
    # wcomb_flat is the b-major flatten of (B, 2H, 2) to match (L,B,2H)->(L,B*2H).
    wfb = params["W_fin"].T.reshape(B, 2, 2)             # wfb[b,j,k] = Wfin[k, 2b+j]
    wcomb = jnp.einsum("jh,bjk->bhk", params["W_lin"], wfb)          # (B, 2H, 2)
    wcomb_flat = wcomb.reshape(B * 2 * H, 2)                         # (B*2H, 2)
    bout = (params["b_fin"]
            + jnp.einsum("j,bjk->k", params["b_lin"], wfb))[None, :]  # (1, 2)

    inputs = (xcat, wxc, whc, biasc, wcomb_flat, bout)
    vmem = pl.BlockSpec(memory_space=pltpu.MemorySpace.VMEM)
    kernel = functools.partial(rnn_classifier_kernel, L=L, B=B, H=H)
    # NOTE: no scratch buffers and no grid — everything (weights + activations,
    # ~100 KB total) fits VMEM/vregs; the kernel is latency-bound on the serial
    # recurrence, not VMEM-, DMA- or tiling-bound on any TPU generation.
    # TODO(synk): if multiple independent sequences are available, pack them
    # into the batch rows of the recurrence (and shard across the 2nd v7x TC).
    return pl.pallas_call(
        kernel,
        out_shape=jax.ShapeDtypeStruct((L, 2), jnp.float32),
        in_specs=[vmem] * len(inputs),
        out_specs=vmem,
    )(*inputs)


# -----------------------------------------------------------------------------
# Pure-JAX reference (mirrors the PyTorch forward literally)
# -----------------------------------------------------------------------------
def reference(x, params):
    L, B, F = x.shape
    H = params["W_hh_f"].shape[1]

    def run_dir(wih, whh, bih, bhh, reverse):
        xs = x[::-1] if reverse else x

        def step(carry, x_t):
            h, c = carry
            gates = x_t @ wih.T + h @ whh.T + bih + bhh
            i_g = jax.nn.sigmoid(gates[:, 0:H])
            f_g = jax.nn.sigmoid(gates[:, H:2 * H])
            g_g = jnp.tanh(gates[:, 2 * H:3 * H])
            o_g = jax.nn.sigmoid(gates[:, 3 * H:4 * H])
            c_new = f_g * c + i_g * g_g
            h_new = o_g * jnp.tanh(c_new)
            return (h_new, c_new), h_new

        init = (jnp.zeros((B, H), jnp.float32), jnp.zeros((B, H), jnp.float32))
        _, hs = lax.scan(step, init, xs)
        return hs[::-1] if reverse else hs

    hf = run_dir(params["W_ih_f"], params["W_hh_f"],
                 params["b_ih_f"], params["b_hh_f"], reverse=False)
    hb = run_dir(params["W_ih_r"], params["W_hh_r"],
                 params["b_ih_r"], params["b_hh_r"], reverse=True)
    output = jnp.concatenate([hf, hb], axis=-1)              # (L, B, 2H)
    lin = output @ params["W_lin"].T + params["b_lin"]       # (L, B, 2)
    flat = lin.reshape(L, -1)                                # (L, 2B)
    return flat @ params["W_fin"].T + params["b_fin"]        # (L, 2)


# -----------------------------------------------------------------------------
# Main
# -----------------------------------------------------------------------------
if __name__ == "__main__":
    # d_in = (B, F) = (4, 16); hidden_size H = 32; seq len L = 8; bidirectional.
    L, B, F, H = 8, 4, 16, 32

    key = jax.random.PRNGKey(0)
    ks = jax.random.split(key, 16)
    scale = 1.0 / (H ** 0.5)

    def u(k, shape):
        return jax.random.uniform(k, shape, jnp.float32, -scale, scale)

    params = {
        # forward direction LSTM weights (torch shapes, gate order [i, f, g, o])
        "W_ih_f": u(ks[0], (4 * H, F)),
        "W_hh_f": u(ks[1], (4 * H, H)),
        "b_ih_f": u(ks[2], (4 * H,)),
        "b_hh_f": u(ks[3], (4 * H,)),
        # reverse direction
        "W_ih_r": u(ks[4], (4 * H, F)),
        "W_hh_r": u(ks[5], (4 * H, H)),
        "b_ih_r": u(ks[6], (4 * H,)),
        "b_hh_r": u(ks[7], (4 * H,)),
        # linear: 2H -> 2
        "W_lin": u(ks[8], (2, 2 * H)),
        "b_lin": u(ks[9], (2,)),
        # final_layer: 2*B -> 2
        "W_fin": u(ks[10], (2, 2 * B)),
        "b_fin": u(ks[11], (2,)),
    }

    x = jax.random.normal(ks[12], (L, B, F), jnp.float32)

    out = rnn_channel_classifier(x, params)
    out = jax.block_until_ready(out)

    ref = jax.block_until_ready(reference(x, params))
    assert out.shape == (L, 2), out.shape
    assert jnp.allclose(out, ref, rtol=1e-3, atol=1e-3), (
        "mismatch", float(jnp.max(jnp.abs(out - ref))))

    print("KERNEL_OK")
</pallas_src>

<mosaic_0001>
module attributes {stable_mosaic.version = 11 : i64} {
  func.func @rnn_classifier_kernel(%arg0: memref<32x32xf32, #tpu.memory_space<vmem>>, %arg1: memref<32x256xf32, #tpu.memory_space<vmem>>, %arg2: memref<64x256xf32, #tpu.memory_space<vmem>>, %arg3: memref<1x256xf32, #tpu.memory_space<vmem>>, %arg4: memref<256x2xf32, #tpu.memory_space<vmem>>, %arg5: memref<1x2xf32, #tpu.memory_space<vmem>>, %arg6: memref<8x2xf32, #tpu.memory_space<vmem>>) attributes {dimension_semantics = [], scalar_prefetch = 0 : i64, scratch_operands = 0 : i64, tpu.core_type = #tpu.core_type<tc>} {
    %c0 = arith.constant 0 : index
    %c0_0 = arith.constant 0 : index
    %0 = vector.load %arg0[%c0, %c0_0] : memref<32x32xf32, #tpu.memory_space<vmem>>, vector<32x32xf32>
    %c0_1 = arith.constant 0 : index
    %c0_2 = arith.constant 0 : index
    %1 = vector.load %arg1[%c0_1, %c0_2] : memref<32x256xf32, #tpu.memory_space<vmem>>, vector<32x256xf32>
    %cst = arith.constant dense<0.000000e+00> : vector<32x256xf32>
    %2 = tpu.matmul %0, %1, %cst {dimension_numbers = #tpu.dot_dimension_numbers<[1], [0], [0], [1], [0, 0, 1, 1], [], []>} : vector<32x32xf32>, vector<32x256xf32>, vector<32x256xf32> -> vector<32x256xf32>
    %c0_3 = arith.constant 0 : index
    %c0_4 = arith.constant 0 : index
    %3 = vector.load %arg3[%c0_3, %c0_4] : memref<1x256xf32, #tpu.memory_space<vmem>>, vector<1x256xf32>
    %4 = vector.broadcast %3 : vector<1x256xf32> to vector<32x256xf32>
    %5 = arith.addf %2, %4 : vector<32x256xf32>
    %c0_5 = arith.constant 0 : index
    %c0_6 = arith.constant 0 : index
    %6 = vector.load %arg2[%c0_5, %c0_6] : memref<64x256xf32, #tpu.memory_space<vmem>>, vector<64x256xf32>
    %cst_7 = arith.constant 0.000000e+00 : f32
    %7 = vector.broadcast %cst_7 : f32 to vector<4x64xf32>
    %cst_8 = arith.constant 0.000000e+00 : f32
    %8 = vector.broadcast %cst_8 : f32 to vector<4x64xf32>
    %9 = vector.extract_strided_slice %5 {offsets = [0, 0], sizes = [4, 256], strides = [1, 1]} : vector<32x256xf32> to vector<4x256xf32>
    %cst_9 = arith.constant dense<0.000000e+00> : vector<4x256xf32>
    %10 = tpu.matmul %7, %6, %cst_9 {dimension_numbers = #tpu.dot_dimension_numbers<[1], [0], [0], [1], [0, 0, 1, 1], [], []>} : vector<4x64xf32>, vector<64x256xf32>, vector<4x256xf32> -> vector<4x256xf32>
    %11 = arith.addf %9, %10 : vector<4x256xf32>
    %12 = vector.extract_strided_slice %11 {offsets = [0, 0], sizes = [4, 192], strides = [1, 1]} : vector<4x256xf32> to vector<4x192xf32>
    %cst_10 = arith.constant 5.000000e-01 : f32
    %13 = vector.broadcast %cst_10 : f32 to vector<4x192xf32>
    %14 = arith.mulf %13, %12 : vector<4x192xf32>
    %15 = math.tanh %14 : vector<4x192xf32>
    %cst_11 = arith.constant 5.000000e-01 : f32
    %16 = vector.broadcast %cst_11 : f32 to vector<4x192xf32>
    %17 = arith.mulf %16, %15 : vector<4x192xf32>
    %cst_12 = arith.constant 5.000000e-01 : f32
    %18 = vector.broadcast %cst_12 : f32 to vector<4x192xf32>
    %19 = arith.addf %17, %18 : vector<4x192xf32>
    %20 = vector.extract_strided_slice %19 {offsets = [0, 0], sizes = [4, 64], strides = [1, 1]} : vector<4x192xf32> to vector<4x64xf32>
    %21 = vector.extract_strided_slice %19 {offsets = [0, 64], sizes = [4, 64], strides = [1, 1]} : vector<4x192xf32> to vector<4x64xf32>
    %22 = vector.extract_strided_slice %19 {offsets = [0, 128], sizes = [4, 64], strides = [1, 1]} : vector<4x192xf32> to vector<4x64xf32>
    %23 = vector.extract_strided_slice %11 {offsets = [0, 192], sizes = [4, 64], strides = [1, 1]} : vector<4x256xf32> to vector<4x64xf32>
    %24 = math.tanh %23 : vector<4x64xf32>
    %25 = arith.mulf %21, %8 : vector<4x64xf32>
    %26 = arith.mulf %20, %24 : vector<4x64xf32>
    %27 = arith.addf %25, %26 : vector<4x64xf32>
    %28 = math.tanh %27 : vector<4x64xf32>
    %29 = arith.mulf %22, %28 : vector<4x64xf32>
    %30 = vector.extract_strided_slice %29 {offsets = [0, 0], sizes = [4, 32], strides = [1, 1]} : vector<4x64xf32> to vector<4x32xf32>
    %31 = vector.extract_strided_slice %29 {offsets = [0, 32], sizes = [4, 32], strides = [1, 1]} : vector<4x64xf32> to vector<4x32xf32>
    %32 = vector.extract_strided_slice %5 {offsets = [4, 0], sizes = [4, 256], strides = [1, 1]} : vector<32x256xf32> to vector<4x256xf32>
    %cst_13 = arith.constant dense<0.000000e+00> : vector<4x256xf32>
    %33 = tpu.matmul %29, %6, %cst_13 {dimension_numbers = #tpu.dot_dimension_numbers<[1], [0], [0], [1], [0, 0, 1, 1], [], []>} : vector<4x64xf32>, vector<64x256xf32>, vector<4x256xf32> -> vector<4x256xf32>
    %34 = arith.addf %32, %33 : vector<4x256xf32>
    %35 = vector.extract_strided_slice %34 {offsets = [0, 0], sizes = [4, 192], strides = [1, 1]} : vector<4x256xf32> to vector<4x192xf32>
    %cst_14 = arith.constant 5.000000e-01 : f32
    %36 = vector.broadcast %cst_14 : f32 to vector<4x192xf32>
    %37 = arith.mulf %36, %35 : vector<4x192xf32>
    %38 = math.tanh %37 : vector<4x192xf32>
    %cst_15 = arith.constant 5.000000e-01 : f32
    %39 = vector.broadcast %cst_15 : f32 to vector<4x192xf32>
    %40 = arith.mulf %39, %38 : vector<4x192xf32>
    %cst_16 = arith.constant 5.000000e-01 : f32
    %41 = vector.broadcast %cst_16 : f32 to vector<4x192xf32>
    %42 = arith.addf %40, %41 : vector<4x192xf32>
    %43 = vector.extract_strided_slice %42 {offsets = [0, 0], sizes = [4, 64], strides = [1, 1]} : vector<4x192xf32> to vector<4x64xf32>
    %44 = vector.extract_strided_slice %42 {offsets = [0, 64], sizes = [4, 64], strides = [1, 1]} : vector<4x192xf32> to vector<4x64xf32>
    %45 = vector.extract_strided_slice %42 {offsets = [0, 128], sizes = [4, 64], strides = [1, 1]} : vector<4x192xf32> to vector<4x64xf32>
    %46 = vector.extract_strided_slice %34 {offsets = [0, 192], sizes = [4, 64], strides = [1, 1]} : vector<4x256xf32> to vector<4x64xf32>
    %47 = math.tanh %46 : vector<4x64xf32>
    %48 = arith.mulf %44, %27 : vector<4x64xf32>
    %49 = arith.mulf %43, %47 : vector<4x64xf32>
    %50 = arith.addf %48, %49 : vector<4x64xf32>
    %51 = math.tanh %50 : vector<4x64xf32>
    %52 = arith.mulf %45, %51 : vector<4x64xf32>
    %53 = vector.extract_strided_slice %52 {offsets = [0, 0], sizes = [4, 32], strides = [1, 1]} : vector<4x64xf32> to vector<4x32xf32>
    %54 = vector.extract_strided_slice %52 {offsets = [0, 32], sizes = [4, 32], strides = [1, 1]} : vector<4x64xf32> to vector<4x32xf32>
    %55 = vector.extract_strided_slice %5 {offsets = [8, 0], sizes = [4, 256], strides = [1, 1]} : vector<32x256xf32> to vector<4x256xf32>
    %cst_17 = arith.constant dense<0.000000e+00> : vector<4x256xf32>
    %56 = tpu.matmul %52, %6, %cst_17 {dimension_numbers = #tpu.dot_dimension_numbers<[1], [0], [0], [1], [0, 0, 1, 1], [], []>} : vector<4x64xf32>, vector<64x256xf32>, vector<4x256xf32> -> vector<4x256xf32>
    %57 = arith.addf %55, %56 : vector<4x256xf32>
    %58 = vector.extract_strided_slice %57 {offsets = [0, 0], sizes = [4, 192], strides = [1, 1]} : vector<4x256xf32> to vector<4x192xf32>
    %cst_18 = arith.constant 5.000000e-01 : f32
    %59 = vector.broadcast %cst_18 : f32 to vector<4x192xf32>
    %60 = arith.mulf %59, %58 : vector<4x192xf32>
    %61 = math.tanh %60 : vector<4x192xf32>
    %cst_19 = arith.constant 5.000000e-01 : f32
    %62 = vector.broadcast %cst_19 : f32 to vector<4x192xf32>
    %63 = arith.mulf %62, %61 : vector<4x192xf32>
    %cst_20 = arith.constant 5.000000e-01 : f32
    %64 = vector.broadcast %cst_20 : f32 to vector<4x192xf32>
    %65 = arith.addf %63, %64 : vector<4x192xf32>
    %66 = vector.extract_strided_slice %65 {offsets = [0, 0], sizes = [4, 64], strides = [1, 1]} : vector<4x192xf32> to vector<4x64xf32>
    %67 = vector.extract_strided_slice %65 {offsets = [0, 64], sizes = [4, 64], strides = [1, 1]} : vector<4x192xf32> to vector<4x64xf32>
    %68 = vector.extract_strided_slice %65 {offsets = [0, 128], sizes = [4, 64], strides = [1, 1]} : vector<4x192xf32> to vector<4x64xf32>
    %69 = vector.extract_strided_slice %57 {offsets = [0, 192], sizes = [4, 64], strides = [1, 1]} : vector<4x256xf32> to vector<4x64xf32>
    %70 = math.tanh %69 : vector<4x64xf32>
    %71 = arith.mulf %67, %50 : vector<4x64xf32>
    %72 = arith.mulf %66, %70 : vector<4x64xf32>
    %73 = arith.addf %71, %72 : vector<4x64xf32>
    %74 = math.tanh %73 : vector<4x64xf32>
    %75 = arith.mulf %68, %74 : vector<4x64xf32>
    %76 = vector.extract_strided_slice %75 {offsets = [0, 0], sizes = [4, 32], strides = [1, 1]} : vector<4x64xf32> to vector<4x32xf32>
    %77 = vector.extract_strided_slice %75 {offsets = [0, 32], sizes = [4, 32], strides = [1, 1]} : vector<4x64xf32> to vector<4x32xf32>
    %78 = vector.extract_strided_slice %5 {offsets = [12, 0], sizes = [4, 256], strides = [1, 1]} : vector<32x256xf32> to vector<4x256xf32>
    %cst_21 = arith.constant dense<0.000000e+00> : vector<4x256xf32>
    %79 = tpu.matmul %75, %6, %cst_21 {dimension_numbers = #tpu.dot_dimension_numbers<[1], [0], [0], [1], [0, 0, 1, 1], [], []>} : vector<4x64xf32>, vector<64x256xf32>, vector<4x256xf32> -> vector<4x256xf32>
    %80 = arith.addf %78, %79 : vector<4x256xf32>
    %81 = vector.extract_strided_slice %80 {offsets = [0, 0], sizes = [4, 192], strides = [1, 1]} : vector<4x256xf32> to vector<4x192xf32>
    %cst_22 = arith.constant 5.000000e-01 : f32
    %82 = vector.broadcast %cst_22 : f32 to vector<4x192xf32>
    %83 = arith.mulf %82, %81 : vector<4x192xf32>
    %84 = math.tanh %83 : vector<4x192xf32>
    %cst_23 = arith.constant 5.000000e-01 : f32
    %85 = vector.broadcast %cst_23 : f32 to vector<4x192xf32>
    %86 = arith.mulf %85, %84 : vector<4x192xf32>
    %cst_24 = arith.constant 5.000000e-01 : f32
    %87 = vector.broadcast %cst_24 : f32 to vector<4x192xf32>
    %88 = arith.addf %86, %87 : vector<4x192xf32>
    %89 = vector.extract_strided_slice %88 {offsets = [0, 0], sizes = [4, 64], strides = [1, 1]} : vector<4x192xf32> to vector<4x64xf32>
    %90 = vector.extract_strided_slice %88 {offsets = [0, 64], sizes = [4, 64], strides = [1, 1]} : vector<4x192xf32> to vector<4x64xf32>
    %91 = vector.extract_strided_slice %88 {offsets = [0, 128], sizes = [4, 64], strides = [1, 1]} : vector<4x192xf32> to vector<4x64xf32>
    %92 = vector.extract_strided_slice %80 {offsets = [0, 192], sizes = [4, 64], strides = [1, 1]} : vector<4x256xf32> to vector<4x64xf32>
    %93 = math.tanh %92 : vector<4x64xf32>
    %94 = arith.mulf %90, %73 : vector<4x64xf32>
    %95 = arith.mulf %89, %93 : vector<4x64xf32>
    %96 = arith.addf %94, %95 : vector<4x64xf32>
    %97 = math.tanh %96 : vector<4x64xf32>
    %98 = arith.mulf %91, %97 : vector<4x64xf32>
    %99 = vector.extract_strided_slice %98 {offsets = [0, 0], sizes = [4, 32], strides = [1, 1]} : vector<4x64xf32> to vector<4x32xf32>
    %100 = vector.extract_strided_slice %98 {offsets = [0, 32], sizes = [4, 32], strides = [1, 1]} : vector<4x64xf32> to vector<4x32xf32>
    %101 = vector.extract_strided_slice %5 {offsets = [16, 0], sizes = [4, 256], strides = [1, 1]} : vector<32x256xf32> to vector<4x256xf32>
    %cst_25 = arith.constant dense<0.000000e+00> : vector<4x256xf32>
    %102 = tpu.matmul %98, %6, %cst_25 {dimension_numbers = #tpu.dot_dimension_numbers<[1], [0], [0], [1], [0, 0, 1, 1], [], []>} : vector<4x64xf32>, vector<64x256xf32>, vector<4x256xf32> -> vector<4x256xf32>
    %103 = arith.addf %101, %102 : vector<4x256xf32>
    %104 = vector.extract_strided_slice %103 {offsets = [0, 0], sizes = [4, 192], strides = [1, 1]} : vector<4x256xf32> to vector<4x192xf32>
    %cst_26 = arith.constant 5.000000e-01 : f32
    %105 = vector.broadcast %cst_26 : f32 to vector<4x192xf32>
    %106 = arith.mulf %105, %104 : vector<4x192xf32>
    %107 = math.tanh %106 : vector<4x192xf32>
    %cst_27 = arith.constant 5.000000e-01 : f32
    %108 = vector.broadcast %cst_27 : f32 to vector<4x192xf32>
    %109 = arith.mulf %108, %107 : vector<4x192xf32>
    %cst_28 = arith.constant 5.000000e-01 : f32
    %110 = vector.broadcast %cst_28 : f32 to vector<4x192xf32>
    %111 = arith.addf %109, %110 : vector<4x192xf32>
    %112 = vector.extract_strided_slice %111 {offsets = [0, 0], sizes = [4, 64], strides = [1, 1]} : vector<4x192xf32> to vector<4x64xf32>
    %113 = vector.extract_strided_slice %111 {offsets = [0, 64], sizes = [4, 64], strides = [1, 1]} : vector<4x192xf32> to vector<4x64xf32>
    %114 = vector.extract_strided_slice %111 {offsets = [0, 128], sizes = [4, 64], strides = [1, 1]} : vector<4x192xf32> to vector<4x64xf32>
    %115 = vector.extract_strided_slice %103 {offsets = [0, 192], sizes = [4, 64], strides = [1, 1]} : vector<4x256xf32> to vector<4x64xf32>
    %116 = math.tanh %115 : vector<4x64xf32>
    %117 = arith.mulf %113, %96 : vector<4x64xf32>
    %118 = arith.mulf %112, %116 : vector<4x64xf32>
    %119 = arith.addf %117, %118 : vector<4x64xf32>
    %120 = math.tanh %119 : vector<4x64xf32>
    %121 = arith.mulf %114, %120 : vector<4x64xf32>
    %122 = vector.extract_strided_slice %121 {offsets = [0, 0], sizes = [4, 32], strides = [1, 1]} : vector<4x64xf32> to vector<4x32xf32>
    %123 = vector.extract_strided_slice %121 {offsets = [0, 32], sizes = [4, 32], strides = [1, 1]} : vector<4x64xf32> to vector<4x32xf32>
    %124 = vector.extract_strided_slice %5 {offsets = [20, 0], sizes = [4, 256], strides = [1, 1]} : vector<32x256xf32> to vector<4x256xf32>
    %cst_29 = arith.constant dense<0.000000e+00> : vector<4x256xf32>
    %125 = tpu.matmul %121, %6, %cst_29 {dimension_numbers = #tpu.dot_dimension_numbers<[1], [0], [0], [1], [0, 0, 1, 1], [], []>} : vector<4x64xf32>, vector<64x256xf32>, vector<4x256xf32> -> vector<4x256xf32>
    %126 = arith.addf %124, %125 : vector<4x256xf32>
    %127 = vector.extract_strided_slice %126 {offsets = [0, 0], sizes = [4, 192], strides = [1, 1]} : vector<4x256xf32> to vector<4x192xf32>
    %cst_30 = arith.constant 5.000000e-01 : f32
    %128 = vector.broadcast %cst_30 : f32 to vector<4x192xf32>
    %129 = arith.mulf %128, %127 : vector<4x192xf32>
    %130 = math.tanh %129 : vector<4x192xf32>
    %cst_31 = arith.constant 5.000000e-01 : f32
    %131 = vector.broadcast %cst_31 : f32 to vector<4x192xf32>
    %132 = arith.mulf %131, %130 : vector<4x192xf32>
    %cst_32 = arith.constant 5.000000e-01 : f32
    %133 = vector.broadcast %cst_32 : f32 to vector<4x192xf32>
    %134 = arith.addf %132, %133 : vector<4x192xf32>
    %135 = vector.extract_strided_slice %134 {offsets = [0, 0], sizes = [4, 64], strides = [1, 1]} : vector<4x192xf32> to vector<4x64xf32>
    %136 = vector.extract_strided_slice %134 {offsets = [0, 64], sizes = [4, 64], strides = [1, 1]} : vector<4x192xf32> to vector<4x64xf32>
    %137 = vector.extract_strided_slice %134 {offsets = [0, 128], sizes = [4, 64], strides = [1, 1]} : vector<4x192xf32> to vector<4x64xf32>
    %138 = vector.extract_strided_slice %126 {offsets = [0, 192], sizes = [4, 64], strides = [1, 1]} : vector<4x256xf32> to vector<4x64xf32>
    %139 = math.tanh %138 : vector<4x64xf32>
    %140 = arith.mulf %136, %119 : vector<4x64xf32>
    %141 = arith.mulf %135, %139 : vector<4x64xf32>
    %142 = arith.addf %140, %141 : vector<4x64xf32>
    %143 = math.tanh %142 : vector<4x64xf32>
    %144 = arith.mulf %137, %143 : vector<4x64xf32>
    %145 = vector.extract_strided_slice %144 {offsets = [0, 0], sizes = [4, 32], strides = [1, 1]} : vector<4x64xf32> to vector<4x32xf32>
    %146 = vector.extract_strided_slice %144 {offsets = [0, 32], sizes = [4, 32], strides = [1, 1]} : vector<4x64xf32> to vector<4x32xf32>
    %147 = vector.extract_strided_slice %5 {offsets = [24, 0], sizes = [4, 256], strides = [1, 1]} : vector<32x256xf32> to vector<4x256xf32>
    %cst_33 = arith.constant dense<0.000000e+00> : vector<4x256xf32>
    %148 = tpu.matmul %144, %6, %cst_33 {dimension_numbers = #tpu.dot_dimension_numbers<[1], [0], [0], [1], [0, 0, 1, 1], [], []>} : vector<4x64xf32>, vector<64x256xf32>, vector<4x256xf32> -> vector<4x256xf32>
    %149 = arith.addf %147, %148 : vector<4x256xf32>
    %150 = vector.extract_strided_slice %149 {offsets = [0, 0], sizes = [4, 192], strides = [1, 1]} : vector<4x256xf32> to vector<4x192xf32>
    %cst_34 = arith.constant 5.000000e-01 : f32
    %151 = vector.broadcast %cst_34 : f32 to vector<4x192xf32>
    %152 = arith.mulf %151, %150 : vector<4x192xf32>
    %153 = math.tanh %152 : vector<4x192xf32>
    %cst_35 = arith.constant 5.000000e-01 : f32
    %154 = vector.broadcast %cst_35 : f32 to vector<4x192xf32>
    %155 = arith.mulf %154, %153 : vector<4x192xf32>
    %cst_36 = arith.constant 5.000000e-01 : f32
    %156 = vector.broadcast %cst_36 : f32 to vector<4x192xf32>
    %157 = arith.addf %155, %156 : vector<4x192xf32>
    %158 = vector.extract_strided_slice %157 {offsets = [0, 0], sizes = [4, 64], strides = [1, 1]} : vector<4x192xf32> to vector<4x64xf32>
    %159 = vector.extract_strided_slice %157 {offsets = [0, 64], sizes = [4, 64], strides = [1, 1]} : vector<4x192xf32> to vector<4x64xf32>
    %160 = vector.extract_strided_slice %157 {offsets = [0, 128], sizes = [4, 64], strides = [1, 1]} : vector<4x192xf32> to vector<4x64xf32>
    %161 = vector.extract_strided_slice %149 {offsets = [0, 192], sizes = [4, 64], strides = [1, 1]} : vector<4x256xf32> to vector<4x64xf32>
    %162 = math.tanh %161 : vector<4x64xf32>
    %163 = arith.mulf %159, %142 : vector<4x64xf32>
    %164 = arith.mulf %158, %162 : vector<4x64xf32>
    %165 = arith.addf %163, %164 : vector<4x64xf32>
    %166 = math.tanh %165 : vector<4x64xf32>
    %167 = arith.mulf %160, %166 : vector<4x64xf32>
    %168 = vector.extract_strided_slice %167 {offsets = [0, 0], sizes = [4, 32], strides = [1, 1]} : vector<4x64xf32> to vector<4x32xf32>
    %169 = vector.extract_strided_slice %167 {offsets = [0, 32], sizes = [4, 32], strides = [1, 1]} : vector<4x64xf32> to vector<4x32xf32>
    %170 = vector.extract_strided_slice %5 {offsets = [28, 0], sizes = [4, 256], strides = [1, 1]} : vector<32x256xf32> to vector<4x256xf32>
    %cst_37 = arith.constant dense<0.000000e+00> : vector<4x256xf32>
    %171 = tpu.matmul %167, %6, %cst_37 {dimension_numbers = #tpu.dot_dimension_numbers<[1], [0], [0], [1], [0, 0, 1, 1], [], []>} : vector<4x64xf32>, vector<64x256xf32>, vector<4x256xf32> -> vector<4x256xf32>
    %172 = arith.addf %170, %171 : vector<4x256xf32>
    %173 = vector.extract_strided_slice %172 {offsets = [0, 0], sizes = [4, 192], strides = [1, 1]} : vector<4x256xf32> to vector<4x192xf32>
    %cst_38 = arith.constant 5.000000e-01 : f32
    %174 = vector.broadcast %cst_38 : f32 to vector<4x192xf32>
    %175 = arith.mulf %174, %173 : vector<4x192xf32>
    %176 = math.tanh %175 : vector<4x192xf32>
    %cst_39 = arith.constant 5.000000e-01 : f32
    %177 = vector.broadcast %cst_39 : f32 to vector<4x192xf32>
    %178 = arith.mulf %177, %176 : vector<4x192xf32>
    %cst_40 = arith.constant 5.000000e-01 : f32
    %179 = vector.broadcast %cst_40 : f32 to vector<4x192xf32>
    %180 = arith.addf %178, %179 : vector<4x192xf32>
    %181 = vector.extract_strided_slice %180 {offsets = [0, 0], sizes = [4, 64], strides = [1, 1]} : vector<4x192xf32> to vector<4x64xf32>
    %182 = vector.extract_strided_slice %180 {offsets = [0, 64], sizes = [4, 64], strides = [1, 1]} : vector<4x192xf32> to vector<4x64xf32>
    %183 = vector.extract_strided_slice %180 {offsets = [0, 128], sizes = [4, 64], strides = [1, 1]} : vector<4x192xf32> to vector<4x64xf32>
    %184 = vector.extract_strided_slice %172 {offsets = [0, 192], sizes = [4, 64], strides = [1, 1]} : vector<4x256xf32> to vector<4x64xf32>
    %185 = math.tanh %184 : vector<4x64xf32>
    %186 = arith.mulf %182, %165 : vector<4x64xf32>
    %187 = arith.mulf %181, %185 : vector<4x64xf32>
    %188 = arith.addf %186, %187 : vector<4x64xf32>
    %189 = math.tanh %188 : vector<4x64xf32>
    %190 = arith.mulf %183, %189 : vector<4x64xf32>
    %191 = vector.extract_strided_slice %190 {offsets = [0, 0], sizes = [4, 32], strides = [1, 1]} : vector<4x64xf32> to vector<4x32xf32>
    %192 = vector.extract_strided_slice %190 {offsets = [0, 32], sizes = [4, 32], strides = [1, 1]} : vector<4x64xf32> to vector<4x32xf32>
    %193 = tpu.concatenate %30, %192 in 1 : vector<4x32xf32>, vector<4x32xf32> -> vector<4x64xf32>
    %194 = tpu.concatenate %53, %169 in 1 : vector<4x32xf32>, vector<4x32xf32> -> vector<4x64xf32>
    %195 = tpu.concatenate %76, %146 in 1 : vector<4x32xf32>, vector<4x32xf32> -> vector<4x64xf32>
    %196 = tpu.concatenate %99, %123 in 1 : vector<4x32xf32>, vector<4x32xf32> -> vector<4x64xf32>
    %197 = tpu.concatenate %122, %100 in 1 : vector<4x32xf32>, vector<4x32xf32> -> vector<4x64xf32>
    %198 = tpu.concatenate %145, %77 in 1 : vector<4x32xf32>, vector<4x32xf32> -> vector<4x64xf32>
    %199 = tpu.concatenate %168, %54 in 1 : vector<4x32xf32>, vector<4x32xf32> -> vector<4x64xf32>
    %200 = tpu.concatenate %191, %31 in 1 : vector<4x32xf32>, vector<4x32xf32> -> vector<4x64xf32>
    %201 = vector.shape_cast %193 : vector<4x64xf32> to vector<1x4x64xf32>
    %202 = vector.shape_cast %194 : vector<4x64xf32> to vector<1x4x64xf32>
    %203 = vector.shape_cast %195 : vector<4x64xf32> to vector<1x4x64xf32>
    %204 = vector.shape_cast %196 : vector<4x64xf32> to vector<1x4x64xf32>
    %205 = vector.shape_cast %197 : vector<4x64xf32> to vector<1x4x64xf32>
    %206 = vector.shape_cast %198 : vector<4x64xf32> to vector<1x4x64xf32>
    %207 = vector.shape_cast %199 : vector<4x64xf32> to vector<1x4x64xf32>
    %208 = vector.shape_cast %200 : vector<4x64xf32> to vector<1x4x64xf32>
    %209 = tpu.concatenate %201, %202, %203, %204, %205, %206, %207, %208 in 0 : vector<1x4x64xf32>, vector<1x4x64xf32>, vector<1x4x64xf32>, vector<1x4x64xf32>, vector<1x4x64xf32>, vector<1x4x64xf32>, vector<1x4x64xf32>, vector<1x4x64xf32> -> vector<8x4x64xf32>
    %210 = vector.shape_cast %209 : vector<8x4x64xf32> to vector<8x256xf32>
    %c0_41 = arith.constant 0 : index
    %c0_42 = arith.constant 0 : index
    %211 = vector.load %arg4[%c0_41, %c0_42] : memref<256x2xf32, #tpu.memory_space<vmem>>, vector<256x2xf32>
    %cst_43 = arith.constant dense<0.000000e+00> : vector<8x2xf32>
    %212 = tpu.matmul %210, %211, %cst_43 {dimension_numbers = #tpu.dot_dimension_numbers<[1], [0], [0], [1], [0, 0, 1, 1], [], []>} : vector<8x256xf32>, vector<256x2xf32>, vector<8x2xf32> -> vector<8x2xf32>
    %c0_44 = arith.constant 0 : index
    %c0_45 = arith.constant 0 : index
    %213 = vector.load %arg5[%c0_44, %c0_45] : memref<1x2xf32, #tpu.memory_space<vmem>>, vector<1x2xf32>
    %214 = vector.broadcast %213 : vector<1x2xf32> to vector<8x2xf32>
    %215 = arith.addf %212, %214 : vector<8x2xf32>
    %c0_46 = arith.constant 0 : index
    %c0_47 = arith.constant 0 : index
    %216 = vector.load %arg6[%c0_46, %c0_47] : memref<8x2xf32, #tpu.memory_space<vmem>>, vector<8x2xf32>
    tpu.vector_store %arg6[%c0_46, %c0_47], %215 {strides = array<i32>} : memref<8x2xf32, #tpu.memory_space<vmem>>, vector<8x2xf32>,
    return
  }
}

</mosaic_0001>

<bundles_post_ra>
// kernel: rnn_channel_classifier.1
= control target key start
LH: loop header
LB: loop body
LE: loop exit
PB: predicated region body
PF: predicated region fallthrough
CT: control target
= control target key end

     0   :  { %v1545_v3 = vmov 0.0   ;;  %vm47_vm0 = vcmask 261120   ;;  %v37_v41 = vlaneseq  ;;  %vm165_vm1 = vcmask 523264   ;;  %s1997_s1 = inlined_call_operand.vmem [shape: f32[32,256], index: 1, kind: input, shape index: {}]   ;;  %s1998_s2 = inlined_call_operand.vmem [shape: f32[64,256], index: 2, kind: input, shape index: {}]   ;;  %s1999_s0 = inlined_call_operand.vmem [shape: f32[32,32], index: 0, kind: input, shape index: {}]   ;;  %s2000_s3 = inlined_call_operand.vmem [shape: f32[1,256], index: 3, kind: input, shape index: {}]   ;;  %s2001_s4 = inlined_call_operand.vmem [shape: f32[256,2], index: 4, kind: input, shape index: {}]   ;;  %s2002_s5 = inlined_call_operand.vmem [shape: f32[1,2], index: 5, kind: input, shape index: {}]   ;;  %s2003_s6 = inlined_call_operand.vmem [shape: f32[8,2], index: 6, kind: output, shape index: {}]  }
   0x1   :  { %v28_v0 = vld [vmem:[%s1997_s1 + $0x8] sm:$0xff]  ;;  %v30_v1 = vld [vmem:[%s1997_s1 + $0x18] sm:$0xff]  ;;  %v27_v2 = vld [vmem:[%s1997_s1] sm:$0xff]  ;;  %124 = vmatprep.mubr.f32.mxu0 %v1545_v3  ;;  %447 = vmatprep.mubr.f32.mxu1 %v1545_v3  ;;  %vm1251_vm2 = vcmask 15360  }
   0x2   :  { %v1304_v4 = vpack.c.bf16 %v30_v1, %v28_v0  ;;  %v29_v5 = vld [vmem:[%s1997_s1 + $0x10] sm:$0xff]  ;;  %v32_v6 = vld [vmem:[%s1997_s1 + $0x28] sm:$0xff]  ;;  %v34_v7 = vld [vmem:[%s1997_s1 + $0x38] sm:$0xff]  ;;  %v1722_v42 = vshrl.u32 %v37_v41, 7 }
   0x3   :  { %v1306_v8 = vpack.c.bf16 %v29_v5, %v27_v2  ;;  %v1308_v9 = vpack.c.bf16 %v34_v7, %v32_v6  ;;  %v31_v10 = vld [vmem:[%s1997_s1 + $0x20] sm:$0xff]  ;;  %v33_v11 = vld [vmem:[%s1997_s1 + $0x30] sm:$0xff]  ;;  %v150_v12 = vld [vmem:[%s1998_s2 + $0x8] sm:$0xff] }
   0x4   :  { %1305 = vmatprep.subr.bf16.mxu0 %v1304_v4  ;;  %v152_v13 = vld [vmem:[%s1998_s2 + $0x18] sm:$0xff]  ;;  %v149_v14 = vld [vmem:[%s1998_s2] sm:$0xff]  ;;  %v1310_v15 = vpack.c.bf16 %v33_v11, %v31_v10  ;;  %v151_v17 = vld [vmem:[%s1998_s2 + $0x10] sm:$0xff]  ;;  %v39_v43 = vsub.s32 0, %v1722_v42  ;;  %v43_v46 = vsub.s32 1, %v1722_v42 }
   0x5   :  { %1307 = vmatpush1.bf16.msra.mxu0 %v1306_v8  ;;  %v1619_v16 = vpack.c.bf16 %v152_v13, %v150_v12  ;;  %v154_v18 = vld [vmem:[%s1998_s2 + $0x28] sm:$0xff]  ;;  %v1627_v19 = vpack.c.bf16 %v151_v17, %v149_v14  ;;  %v156_v20 = vld [vmem:[%s1998_s2 + $0x38] sm:$0xff]  ;;  %v153_v22 = vld [vmem:[%s1998_s2 + $0x20] sm:$0xff] }
   0x6   :  { %1309 = vmatprep.subr.bf16.mxu0 %v1308_v9  ;;  %v1632_v21 = vpack.c.bf16 %v156_v20, %v154_v18  ;;  %v155_v23 = vld [vmem:[%s1998_s2 + $0x30] sm:$0xff]  ;;  %v23_v24 = vld [vmem:[%s1999_s0] sm:$0xff]  ;;  %v158_v25 = vld [vmem:[%s1998_s2 + $0x48] sm:$0xff] }
   0x7   :  { %1345 = vmatprep.subr.bf16.mxu1 %v1619_v16  ;;  %v160_v26 = vld [vmem:[%s1998_s2 + $0x58] sm:$0xff]  ;;  %v1653_v27 = vpack.c.bf16 %v155_v23, %v153_v22  ;;  %v157_v28 = vld [vmem:[%s1998_s2 + $0x40] sm:$0xff]  ;;  %v159_v29 = vld [vmem:[%s1998_s2 + $0x50] sm:$0xff] }
   0x8   :  { %1347 = vmatpush1.bf16.msra.mxu1 %v1627_v19  ;;  %v1662_v30 = vpack.c.bf16 %v160_v26, %v158_v25  ;;  %v24_v31 = vld [vmem:[%s1999_s0 + $0x8] sm:$0xff]  ;;  %v164_v33 = vld [vmem:[%s1998_s2 + $0x78] sm:$0xff]  ;;  %v1677_v34 = vpack.c.bf16 %v159_v29, %v157_v28  ;;  %v161_v35 = vld [vmem:[%s1998_s2 + $0x60] sm:$0xff] }
   0x9   :  { %1311 = vmatpush1.bf16.msra.mxu0 %v1310_v15  ;;  %1349 = vmatprep.subr.bf16.mxu1 %v1632_v21  ;;  %v162_v32 = vld [vmem:[%s1998_s2 + $0x68] sm:$0xff]  ;;  %v163_v36 = vld [vmem:[%s1998_s2 + $0x70] sm:$0xff]  ;;  %v26_v40 = vld [vmem:[%s1999_s0 + $0x18] sm:$0xff] }
   0xa   :  { %1313 = vmatprep.subr.bf16.mxu0 %v1619_v16  ;;  %v1687_v37 = vpack.c.bf16 %v164_v33, %v162_v32  ;;  %v25_v38 = vld [vmem:[%s1999_s0 + $0x10] sm:$0xff]  ;;  %v1696_v39 = vpack.c.bf16 %v163_v36, %v161_v35  ;;  %v35_v44 = vld [vmem:[%s2000_s3] sm:$0x3]  ;;  %s1546_s3 = smov 64  }
   0xb   :  { %v40_v48 = vrot.slane %v35_v44, %v39_v43  ;;  %v44_v49 = vrot.slane %v35_v44, %v43_v46 }
   0xc   :  { %1257 = vmatmul.mubr.msk.f32.vlgmr.msra.gmra.mrb[0].mxu0 %vm47_vm0, %v23_v24  ;;  %1351 = vmatpush1.bf16.msra.mxu1 %v1653_v27 }
   0xd   :  { %1315 = vmatpush1.bf16.msra.mxu0 %v1627_v19  ;;  %130 = vmatprep.mubr.f32.mxu0 %v1545_v3 }
   0xe   :  { %1317 = vmatprep.subr.bf16.mxu0 %v1632_v21  ;;  %1353 = vmatprep.subr.bf16.mxu1 %v1662_v30 }
  0x10   :  { %1258 = vmatmul.mubr.msk.f32.gmra.mrb[2].mxu0 %vm47_vm0, %v24_v31  ;;  %1355 = vmatpush1.bf16.msra.mxu1 %v1677_v34 }
  0x11   :  { %1319 = vmatpush1.bf16.msra.mxu0 %v1653_v27  ;;  %136 = vmatprep.mubr.f32.mxu0 %v1545_v3 }
  0x12   :  { %1321 = vmatprep.subr.bf16.mxu0 %v1662_v30  ;;  %1357 = vmatprep.subr.bf16.mxu1 %v1687_v37 }
  0x14   :  { %1259 = vmatmul.mubr.msk.f32.gmra.mrb[4].mxu0 %vm47_vm0, %v25_v38  ;;  %1359 = vmatpush1.bf16.msra.mxu1 %v1696_v39 }
  0x15   :  { %1323 = vmatpush1.bf16.msra.mxu0 %v1677_v34  ;;  %142 = vmatprep.mubr.f32.mxu0 %v1545_v3 }
  0x16   :  { %1325 = vmatprep.subr.bf16.mxu0 %v1687_v37  ;;  %1377 = vmatprep.subr.bf16.mxu1 %v1619_v16 }
  0x18   :  { %1260 = vmatmul.mubr.msk.f32.gmra.mrb[6].mxu0 %vm47_vm0, %v26_v40 }
  0x19   :  { %1327 = vmatpush1.bf16.msra.mxu0 %v1696_v39  ;;  %233 = vmatprep.mubr.f32.mxu0 %v1545_v3 }
  0x1a   :  { %1329 = vmatprep.subr.bf16.mxu0 %v1619_v16 }
  0x1c   :  { %234 = vmatmul.mubr.f32.vlgmr.msra.gmra.mrb[8].mxu0 %v1545_v3 }
  0x1d   :  { %1331 = vmatpush1.bf16.msra.mxu0 %v1627_v19  ;;  %335 = vmatprep.mubr.f32.mxu0 %v1545_v3 }
  0x1e   :  { %1333 = vmatprep.subr.bf16.mxu0 %v1632_v21 }
  0x21   :  { %1335 = vmatpush1.bf16.msra.mxu0 %v1653_v27 }
  0x22   :  { %1337 = vmatprep.subr.bf16.mxu0 %v1662_v30 }
  0x25   :  { %1339 = vmatpush1.bf16.msra.mxu0 %v1677_v34 }
  0x26   :  { %1341 = vmatprep.subr.bf16.mxu0 %v1687_v37 }
  0x29   :  { %1343 = vmatpush1.bf16.msra.mxu0 %v1696_v39 }
  0x2a   :  { %1361 = vmatprep.subr.bf16.mxu0 %v1619_v16 }
  0xdf   :  { %v126_v45 = vpop.f32.mrb[0].mxu0 }
  0xe0   :  { %v128_v47 = vpop.f32.mrb[1].mxu0  ;;  %v127_v4 = vadd.f32 %v126_v45, %v40_v48 }
  0xe1   :  { %v129_v62 = vadd.f32 %v128_v47, %v44_v49 }
  0xe3   :  { %v132_v50 = vpop.f32.mrb[2].mxu0 }
  0xe4   :  { %v1729_v51 = vadd.f32 %v132_v50, %v40_v48  ;;  %v134_v52 = vpop.f32.mrb[3].mxu0 }
  0xe5   :  { %v1731_v53 = vadd.f32 %v134_v52, %v44_v49 }
  0xe7   :  { %v138_v54 = vpop.f32.mrb[4].mxu0 }
  0xe8   :  { %v1733_v55 = vadd.f32 %v138_v54, %v40_v48  ;;  %v140_v56 = vpop.f32.mrb[5].mxu0 }
  0xe9   :  { %v1735_v57 = vadd.f32 %v140_v56, %v44_v49 }
  0xeb   :  { %v144_v58 = vpop.f32.mrb[6].mxu0 }
  0xec   :  { %v1737_v59 = vadd.f32 %v144_v58, %v40_v48  ;;  %v146_v60 = vpop.f32.mrb[7].mxu0 }
  0xed   :  { %v1739_v61 = vadd.f32 %v146_v60, %v44_v49 }
  0xef   :  { %v235_v63 = vpop.f32.mrb[8].mxu0 }
  0xf0   :  { %v237_v0 = vpop.f32.mrb[9].mxu0  ;;  %v240_v5 = vadd.f32 %v235_v63, %v127_v4 }
  0xf1   :  { %v241_v1 = vadd.f32 %v237_v0, %v129_v62 }
  0xf2   :  { %v242_v6 = vmul.f32 0.5, %v240_v5 }
  0xf3   :  { %1481 = vtanh.f32 %v241_v1  ;;  %v243_v17 = vmul.f32 0.5, %v241_v1 }
  0xf4   :  { %1483 = vtanh.f32 %v242_v6 }
  0xfd   :  { %v1482_v2 = vpop.eup %1481 }
  0xfe   :  { %253 = vrot.lane.b32.xlu0 %v1482_v2, %s1546_s3  ;;  %v1484_v7 = vpop.eup %1483 }
  0xff   :  { %v246_v8 = vmul.f32 0.5, %v1484_v7 }
 0x101   :  { %v248_v9 = vadd.f32 0.5, %v246_v8 }
 0x103   :  { %v251_v12 = vmul.f32 0.0, %v248_v9 }
 0x170   :  { %v254_v10 = vpop.permute.xlu0 %253 }
 0x171   :  { %v256_v11 = vmul.f32 %v254_v10, %v248_v9 }
 0x173   :  { %258 = vrot.lane.b32.xlu0 %v256_v11, %s1546_s3 }
 0x1e5   :  { %v259_v13 = vpop.permute.xlu0 %258 }
 0x1e6   :  { %v261_v14 = vadd.f32 %v259_v13, %v251_v12 }
 0x1e8   :  { %1485 = vtanh.f32 %v261_v14  ;;  %v360_v44 = vrot.slane %v261_v14, 4 }
 0x1e9   :  { %1487 = vtanh.f32 %v243_v17 }
 0x1f2   :  { %v1486_v15 = vpop.eup %1485 }
 0x1f3   :  { %264 = vrot.lane.b32.xlu1 %v1486_v15, %s1546_s3  ;;  %v1488_v18 = vpop.eup %1487 }
 0x1f4   :  { %v247_v20 = vmul.f32 0.5, %v1488_v18 }
 0x1f6   :  { %v249_v22 = vadd.f32 0.5, %v247_v20 }
 0x265   :  { %v265_v23 = vpop.permute.xlu1 %264 }
 0x266   :  { %v1744_v24 = vmul.f32 %v265_v23, %v249_v22 }
 0x268   :  { %1261 = vmatmul.mubr.msk.f32.vlgmr.msra.gmra.mrb[10].mxu0 %vm165_vm1, %v1744_v24 }
 0x269   :  { %1363 = vmatpush1.bf16.msra.mxu0 %v1627_v19  ;;  %552 = vmatprep.mubr.f32.mxu0 %v1545_v3 }
 0x26a   :  { %1365 = vmatprep.subr.bf16.mxu0 %v1632_v21 }
 0x26d   :  { %1367 = vmatpush1.bf16.msra.mxu0 %v1653_v27 }
 0x26e   :  { %1369 = vmatprep.subr.bf16.mxu0 %v1662_v30 }
 0x271   :  { %1371 = vmatpush1.bf16.msra.mxu0 %v1677_v34 }
 0x272   :  { %1373 = vmatprep.subr.bf16.mxu0 %v1687_v37 }
 0x275   :  { %1375 = vmatpush1.bf16.msra.mxu0 %v1696_v39 }
 0x276   :  { %1393 = vmatprep.subr.bf16.mxu0 %v1619_v16 }
 0x33b   :  { %v337_v25 = vpop.f32.mrb[10].mxu0 }
 0x33c   :  { %v339_v26 = vpop.f32.mrb[11].mxu0  ;;  %v344_v32 = vrot.slane %v337_v25, 4 }
 0x33d   :  { %v345_v28 = vrot.slane %v339_v26, 4 }
 0x33e   :  { %v348_v33 = vadd.f32 %v344_v32, %v127_v4 }
 0x33f   :  { %v349_v29 = vadd.f32 %v345_v28, %v129_v62 }
 0x340   :  { %v350_v35 = vmul.f32 0.5, %v348_v33 }
 0x341   :  { %1489 = vtanh.f32 %v349_v29  ;;  %v351_v49 = vmul.f32 0.5, %v349_v29 }
 0x342   :  { %1491 = vtanh.f32 %v350_v35 }
 0x34b   :  { %v1490_v31 = vpop.eup %1489 }
 0x34c   :  { %364 = vrot.lane.b32.xlu1 %v1490_v31, %s1546_s3  ;;  %v1492_v36 = vpop.eup %1491 }
 0x34d   :  { %v354_v38 = vmul.f32 0.5, %v1492_v36 }
 0x34f   :  { %v356_v40 = vadd.f32 0.5, %v354_v38 }
 0x351   :  { %v362_v45 = vmul.f32 %v360_v44, %v356_v40 }
 0x3be   :  { %v365_v41 = vpop.permute.xlu1 %364 }
 0x3bf   :  { %v367_v43 = vmul.f32 %v365_v41, %v356_v40 }
 0x3c1   :  { %369 = vrot.lane.b32.xlu0 %v367_v43, %s1546_s3 }
 0x433   :  { %v370_v46 = vpop.permute.xlu0 %369 }
 0x434   :  { %v372_v47 = vadd.f32 %v370_v46, %v362_v45 }
 0x436   :  { %1493 = vtanh.f32 %v372_v47  ;;  %v466_v10 = vrot.slane %v372_v47, 4 }
 0x437   :  { %1495 = vtanh.f32 %v351_v49 }
 0x440   :  { %v1494_v48 = vpop.eup %1493 }
 0x441   :  { %375 = vrot.lane.b32.xlu1 %v1494_v48, %s1546_s3  ;;  %v1496_v50 = vpop.eup %1495 }
 0x442   :  { %v355_v52 = vmul.f32 0.5, %v1496_v50 }
 0x444   :  { %v357_v54 = vadd.f32 0.5, %v355_v52 }
 0x4b3   :  { %v376_v56 = vpop.permute.xlu1 %375 }
 0x4b4   :  { %v1760_v58 = vmul.f32 %v376_v56, %v357_v54 }
 0x4b6   :  { %v380_v60 = vrot.slane %v1760_v58, 4 }
 0x4b8   :  { %1262 = vmatmul.mubr.msk.f32.vlgmr.msra.gmra.mrb[0].mxu1 %vm165_vm1, %v380_v60 }
 0x4b9   :  { %1379 = vmatpush1.bf16.msra.mxu1 %v1627_v19  ;;  %664 = vmatprep.mubr.f32.mxu1 %v1545_v3 }
 0x4ba   :  { %1381 = vmatprep.subr.bf16.mxu1 %v1632_v21 }
 0x4bd   :  { %1383 = vmatpush1.bf16.msra.mxu1 %v1653_v27 }
 0x4be   :  { %1385 = vmatprep.subr.bf16.mxu1 %v1662_v30 }
 0x4c1   :  { %1387 = vmatpush1.bf16.msra.mxu1 %v1677_v34 }
 0x4c2   :  { %1389 = vmatprep.subr.bf16.mxu1 %v1687_v37 }
 0x4c5   :  { %1391 = vmatpush1.bf16.msra.mxu1 %v1696_v39 }
 0x4c6   :  { %1409 = vmatprep.subr.bf16.mxu1 %v1619_v16 }
 0x58b   :  { %v449_v62 = vpop.f32.mrb[0].mxu1 }
 0x58c   :  { %v451_v63 = vpop.f32.mrb[1].mxu1  ;;  %v454_v2 = vadd.f32 %v449_v62, %v1729_v51 }
 0x58d   :  { %v455_v0 = vadd.f32 %v451_v63, %v1731_v53 }
 0x58e   :  { %v456_v4 = vmul.f32 0.5, %v454_v2 }
 0x58f   :  { %1497 = vtanh.f32 %v455_v0  ;;  %v457_v15 = vmul.f32 0.5, %v455_v0 }
 0x590   :  { %1499 = vtanh.f32 %v456_v4 }
 0x599   :  { %v1498_v1 = vpop.eup %1497 }
 0x59a   :  { %470 = vrot.lane.b32.xlu0 %v1498_v1, %s1546_s3  ;;  %v1500_v5 = vpop.eup %1499 }
 0x59b   :  { %v460_v6 = vmul.f32 0.5, %v1500_v5 }
 0x59d   :  { %v462_v7 = vadd.f32 0.5, %v460_v6 }
 0x59f   :  { %v468_v11 = vmul.f32 %v466_v10, %v462_v7 }
 0x60c   :  { %v471_v8 = vpop.permute.xlu0 %470 }
 0x60d   :  { %v473_v9 = vmul.f32 %v471_v8, %v462_v7 }
 0x60f   :  { %475 = vrot.lane.b32.xlu1 %v473_v9, %s1546_s3 }
 0x681   :  { %v476_v12 = vpop.permute.xlu1 %475 }
 0x682   :  { %v478_v13 = vadd.f32 %v476_v12, %v468_v11 }
 0x684   :  { %1501 = vtanh.f32 %v478_v13 }
 0x685   :  { %1503 = vtanh.f32 %v457_v15 }
 0x68e   :  { %v1502_v14 = vpop.eup %1501 }
 0x68f   :  { %481 = vrot.lane.b32.xlu0 %v1502_v14, %s1546_s3  ;;  %v1504_v17 = vpop.eup %1503 }
 0x690   :  { %v461_v18 = vmul.f32 0.5, %v1504_v17 }
 0x692   :  { %v463_v20 = vadd.f32 0.5, %v461_v18 }
 0x701   :  { %v482_v22 = vpop.permute.xlu0 %481 }
 0x702   :  { %v1780_v23 = vmul.f32 %v482_v22, %v463_v20 }
 0x704   :  { %1263 = vmatmul.mubr.msk.f32.vlgmr.msra.gmra.mrb[12].mxu0 %vm165_vm1, %v1780_v23 }
 0x705   :  { %1395 = vmatpush1.bf16.msra.mxu0 %v1627_v19  ;;  %769 = vmatprep.mubr.f32.mxu0 %v1545_v3 }
 0x706   :  { %1397 = vmatprep.subr.bf16.mxu0 %v1632_v21 }
 0x709   :  { %1399 = vmatpush1.bf16.msra.mxu0 %v1653_v27 }
 0x70a   :  { %1401 = vmatprep.subr.bf16.mxu0 %v1662_v30 }
 0x70d   :  { %1403 = vmatpush1.bf16.msra.mxu0 %v1677_v34 }
 0x70e   :  { %1405 = vmatprep.subr.bf16.mxu0 %v1687_v37 }
 0x711   :  { %1407 = vmatpush1.bf16.msra.mxu0 %v1696_v39 }
 0x712   :  { %1425 = vmatprep.subr.bf16.mxu0 %v1619_v16  ;;  %v577_v16 = vrot.slane %v478_v13, 4 }
 0x7d7   :  { %v554_v25 = vpop.f32.mrb[12].mxu0 }
 0x7d8   :  { %v556_v26 = vpop.f32.mrb[13].mxu0  ;;  %v561_v32 = vrot.slane %v554_v25, 4 }
 0x7d9   :  { %v562_v28 = vrot.slane %v556_v26, 4 }
 0x7da   :  { %v565_v33 = vadd.f32 %v561_v32, %v1729_v51 }
 0x7db   :  { %v566_v29 = vadd.f32 %v562_v28, %v1731_v53 }
 0x7dc   :  { %v567_v35 = vmul.f32 0.5, %v565_v33 }
 0x7dd   :  { %1505 = vtanh.f32 %v566_v29  ;;  %v568_v47 = vmul.f32 0.5, %v566_v29 }
 0x7de   :  { %1507 = vtanh.f32 %v567_v35 }
 0x7e7   :  { %v1506_v31 = vpop.eup %1505 }
 0x7e8   :  { %581 = vrot.lane.b32.xlu1 %v1506_v31, %s1546_s3  ;;  %v1508_v36 = vpop.eup %1507 }
 0x7e9   :  { %v571_v38 = vmul.f32 0.5, %v1508_v36 }
 0x7eb   :  { %v573_v40 = vadd.f32 0.5, %v571_v38 }
 0x7ed   :  { %v579_v44 = vmul.f32 %v577_v16, %v573_v40 }
 0x85a   :  { %v582_v41 = vpop.permute.xlu1 %581 }
 0x85b   :  { %v584_v43 = vmul.f32 %v582_v41, %v573_v40 }
 0x85d   :  { %586 = vrot.lane.b32.xlu0 %v584_v43, %s1546_s3 }
 0x8cf   :  { %v587_v45 = vpop.permute.xlu0 %586 }
 0x8d0   :  { %v589_v53 = vadd.f32 %v587_v45, %v579_v44 }
 0x8d2   :  { %1509 = vtanh.f32 %v589_v53  ;;  %v683_v9 = vrot.slane %v589_v53, 4 }
 0x8d3   :  { %1511 = vtanh.f32 %v568_v47 }
 0x8dc   :  { %v1510_v46 = vpop.eup %1509 }
 0x8dd   :  { %592 = vrot.lane.b32.xlu1 %v1510_v46, %s1546_s3  ;;  %v1512_v51 = vpop.eup %1511 }
 0x8de   :  { %v572_v48 = vmul.f32 0.5, %v1512_v51 }
 0x8e0   :  { %v574_v49 = vadd.f32 0.5, %v572_v48 }
 0x94f   :  { %v593_v50 = vpop.permute.xlu1 %592 }
 0x950   :  { %v1798_v52 = vmul.f32 %v593_v50, %v574_v49 }
 0x952   :  { %v597_v54 = vrot.slane %v1798_v52, 4 }
 0x954   :  { %1264 = vmatmul.mubr.msk.f32.vlgmr.msra.gmra.mrb[2].mxu1 %vm165_vm1, %v597_v54 }
 0x955   :  { %1411 = vmatpush1.bf16.msra.mxu1 %v1627_v19  ;;  %881 = vmatprep.mubr.f32.mxu1 %v1545_v3 }
 0x956   :  { %1413 = vmatprep.subr.bf16.mxu1 %v1632_v21 }
 0x959   :  { %1415 = vmatpush1.bf16.msra.mxu1 %v1653_v27 }
 0x95a   :  { %1417 = vmatprep.subr.bf16.mxu1 %v1662_v30 }
 0x95d   :  { %1419 = vmatpush1.bf16.msra.mxu1 %v1677_v34 }
 0x95e   :  { %1421 = vmatprep.subr.bf16.mxu1 %v1687_v37 }
 0x961   :  { %1423 = vmatpush1.bf16.msra.mxu1 %v1696_v39 }
 0xa27   :  { %v666_v56 = vpop.f32.mrb[2].mxu1 }
 0xa28   :  { %v668_v62 = vpop.f32.mrb[3].mxu1  ;;  %v671_v1 = vadd.f32 %v666_v56, %v1733_v55 }
 0xa29   :  { %v672_v63 = vadd.f32 %v668_v62, %v1735_v57 }
 0xa2a   :  { %v673_v2 = vmul.f32 0.5, %v671_v1 }
 0xa2b   :  { %1513 = vtanh.f32 %v672_v63  ;;  %v674_v14 = vmul.f32 0.5, %v672_v63 }
 0xa2c   :  { %1515 = vtanh.f32 %v673_v2 }
 0xa35   :  { %v1514_v0 = vpop.eup %1513 }
 0xa36   :  { %687 = vrot.lane.b32.xlu0 %v1514_v0, %s1546_s3  ;;  %v1516_v4 = vpop.eup %1515 }
 0xa37   :  { %v677_v5 = vmul.f32 0.5, %v1516_v4 }
 0xa39   :  { %v679_v6 = vadd.f32 0.5, %v677_v5 }
 0xa3b   :  { %v685_v10 = vmul.f32 %v683_v9, %v679_v6 }
 0xaa8   :  { %v688_v7 = vpop.permute.xlu0 %687 }
 0xaa9   :  { %v690_v8 = vmul.f32 %v688_v7, %v679_v6 }
 0xaab   :  { %692 = vrot.lane.b32.xlu1 %v690_v8, %s1546_s3 }
 0xb1d   :  { %v693_v11 = vpop.permute.xlu1 %692 }
 0xb1e   :  { %v695_v12 = vadd.f32 %v693_v11, %v685_v10 }
 0xb20   :  { %1517 = vtanh.f32 %v695_v12 }
 0xb21   :  { %1519 = vtanh.f32 %v674_v14 }
 0xb2a   :  { %v1518_v13 = vpop.eup %1517 }
 0xb2b   :  { %698 = vrot.lane.b32.xlu0 %v1518_v13, %s1546_s3  ;;  %v1520_v15 = vpop.eup %1519 }
 0xb2c   :  { %v678_v17 = vmul.f32 0.5, %v1520_v15 }
 0xb2e   :  { %v680_v18 = vadd.f32 0.5, %v678_v17 }
 0xb9d   :  { %v699_v20 = vpop.permute.xlu0 %698 }
 0xb9e   :  { %v1817_v22 = vmul.f32 %v699_v20, %v680_v18 }
 0xba0   :  { %1265 = vmatmul.mubr.msk.f32.vlgmr.msra.gmra.mrb[14].mxu0 %vm165_vm1, %v1817_v22  ;;  %v1039_v9 = vrot.slane %v1817_v22, 4  ;;  %v1852_v14 = vsel %vm47_vm0, %v1817_v22, %v597_v54 }
 0xba1   :  { %1427 = vmatpush1.bf16.msra.mxu0 %v1627_v19  ;;  %986 = vmatprep.mubr.f32.mxu0 %v1545_v3 }
 0xba2   :  { %1429 = vmatprep.subr.bf16.mxu0 %v1632_v21  ;;  %v1041_v13 = vsel %vm47_vm0, %v1798_v52, %v1039_v9  ;;  %v1151_v9 = vld [vmem:[%s2001_s4 + $0x48] sm:$0xff] }
 0xba5   :  { %1431 = vmatpush1.bf16.msra.mxu0 %v1653_v27 }
 0xba6   :  { %1433 = vmatprep.subr.bf16.mxu0 %v1662_v30 }
 0xba9   :  { %1435 = vmatpush1.bf16.msra.mxu0 %v1677_v34 }
 0xbaa   :  { %1437 = vmatprep.subr.bf16.mxu0 %v1687_v37 }
 0xbad   :  { %1439 = vmatpush1.bf16.msra.mxu0 %v1696_v39  ;;  %v794_v39 = vrot.slane %v695_v12, 4 }
 0xc73   :  { %v771_v25 = vpop.f32.mrb[14].mxu0 }
 0xc74   :  { %v773_v26 = vpop.f32.mrb[15].mxu0  ;;  %v778_v3 = vrot.slane %v771_v25, 4  ;;  %v1056_v25 = vrot.slane %v1041_v13, 4 }
 0xc75   :  { %v779_v28 = vrot.slane %v773_v26, 4 }
 0xc76   :  { %v782_v21 = vadd.f32 %v778_v3, %v1733_v55 }
 0xc77   :  { %v783_v29 = vadd.f32 %v779_v28, %v1735_v57 }
 0xc78   :  { %v784_v27 = vmul.f32 0.5, %v782_v21 }
 0xc79   :  { %1521 = vtanh.f32 %v783_v29  ;;  %v785_v38 = vmul.f32 0.5, %v783_v29 }
 0xc7a   :  { %1523 = vtanh.f32 %v784_v27 }
 0xc83   :  { %v1522_v19 = vpop.eup %1521 }
 0xc84   :  { %798 = vrot.lane.b32.xlu1 %v1522_v19, %s1546_s3  ;;  %v1524_v30 = vpop.eup %1523 }
 0xc85   :  { %v788_v34 = vmul.f32 0.5, %v1524_v30 }
 0xc87   :  { %v790_v31 = vadd.f32 0.5, %v788_v34 }
 0xc89   :  { %v796_v33 = vmul.f32 %v794_v39, %v790_v31 }
 0xcf6   :  { %v799_v37 = vpop.permute.xlu1 %798 }
 0xcf7   :  { %v801_v32 = vmul.f32 %v799_v37, %v790_v31 }
 0xcf9   :  { %803 = vrot.lane.b32.xlu0 %v801_v32, %s1546_s3 }
 0xd6b   :  { %v804_v35 = vpop.permute.xlu0 %803 }
 0xd6c   :  { %v806_v57 = vadd.f32 %v804_v35, %v796_v33  ;;  %v1159_v35 = vld [vmem:[%s2001_s4 + $0x88] sm:$0xff] }
 0xd6e   :  { %1525 = vtanh.f32 %v806_v57  ;;  %v900_v0 = vrot.slane %v806_v57, 4  ;;  %v1142_v57 = vld [vmem:[%s2001_s4] sm:$0xff] }
 0xd6f   :  { %1527 = vtanh.f32 %v785_v38  ;;  %v1143_v38 = vld [vmem:[%s2001_s4 + $0x8] sm:$0xff] }
 0xd78   :  { %v1526_v36 = vpop.eup %1525 }
 0xd79   :  { %809 = vrot.lane.b32.xlu1 %v1526_v36, %s1546_s3  ;;  %v1528_v55 = vpop.eup %1527 }
 0xd7a   :  { %v789_v40 = vmul.f32 0.5, %v1528_v55  ;;  %v1160_v55 = vld [vmem:[%s2001_s4 + $0x90] sm:$0xff] }
 0xd7c   :  { %v791_v41 = vadd.f32 0.5, %v789_v40  ;;  %v1161_v40 = vld [vmem:[%s2001_s4 + $0x98] sm:$0xff] }
 0xdeb   :  { %v810_v43 = vpop.permute.xlu1 %809 }
 0xdec   :  { %v1834_v16 = vmul.f32 %v810_v43, %v791_v41  ;;  %v1442_v41 = vpack.c.bf16 %v1143_v38, %v1142_v57  ;;  %v1444_v43 = vpack.c.bf16 %v1161_v40, %v1160_v55  ;;  %v1173_v57 = vld [vmem:[%s2001_s4 + $0xf8] sm:$0xff] }
 0xdee   :  { %v814_v44 = vrot.slane %v1834_v16, 4 }
 0xdf0   :  { %1266 = vmatmul.mubr.msk.f32.vlgmr.msra.gmra.mrb[4].mxu1 %vm165_vm1, %v814_v44 }
 0xec3   :  { %v883_v45 = vpop.f32.mrb[4].mxu1 }
 0xec4   :  { %v885_v53 = vpop.f32.mrb[5].mxu1  ;;  %v888_v51 = vadd.f32 %v883_v45, %v1737_v59  ;;  %v1144_v45 = vld [vmem:[%s2001_s4 + $0x10] sm:$0xff] }
 0xec5   :  { %v889_v46 = vadd.f32 %v885_v53, %v1739_v61  ;;  %v1145_v53 = vld [vmem:[%s2001_s4 + $0x18] sm:$0xff] }
 0xec6   :  { %v890_v48 = vmul.f32 0.5, %v888_v51  ;;  %v1446_v51 = vpack.c.bf16 %v1145_v53, %v1144_v45 }
 0xec7   :  { %1529 = vtanh.f32 %v889_v46  ;;  %v891_v6 = vmul.f32 0.5, %v889_v46  ;;  %v1162_v46 = vld [vmem:[%s2001_s4 + $0xa0] sm:$0xff] }
 0xec8   :  { %1531 = vtanh.f32 %v890_v48 }
 0xed1   :  { %v1530_v47 = vpop.eup %1529 }
 0xed2   :  { %904 = vrot.lane.b32.xlu0 %v1530_v47, %s1546_s3  ;;  %v1532_v49 = vpop.eup %1531  ;;  %v1163_v47 = vld [vmem:[%s2001_s4 + $0xa8] sm:$0xff] }
 0xed3   :  { %v894_v50 = vmul.f32 0.5, %v1532_v49  ;;  %v1448_v48 = vpack.c.bf16 %v1163_v47, %v1162_v46  ;;  %v1146_v49 = vld [vmem:[%s2001_s4 + $0x20] sm:$0xff] }
 0xed5   :  { %v896_v56 = vadd.f32 0.5, %v894_v50  ;;  %v1147_v50 = vld [vmem:[%s2001_s4 + $0x28] sm:$0xff] }
 0xed7   :  { %v902_v1 = vmul.f32 %v900_v0, %v896_v56 }
 0xf44   :  { %v905_v62 = vpop.permute.xlu0 %904 }
 0xf45   :  { %v907_v63 = vmul.f32 %v905_v62, %v896_v56  ;;  %v1164_v56 = vld [vmem:[%s2001_s4 + $0xb0] sm:$0xff]  ;;  %v1165_v62 = vld [vmem:[%s2001_s4 + $0xb8] sm:$0xff] }
 0xf46   :  { %v1452_v0 = vpack.c.bf16 %v1165_v62, %v1164_v56 }
 0xf47   :  { %909 = vrot.lane.b32.xlu1 %v907_v63, %s1546_s3  ;;  %v1450_v63 = vpack.c.bf16 %v1147_v50, %v1146_v49 }
 0xfb9   :  { %v910_v2 = vpop.permute.xlu1 %909 }
 0xfba   :  { %v912_v4 = vadd.f32 %v910_v2, %v902_v1  ;;  %v1148_v1 = vld [vmem:[%s2001_s4 + $0x30] sm:$0xff]  ;;  %v1149_v2 = vld [vmem:[%s2001_s4 + $0x38] sm:$0xff] }
 0xfbc   :  { %1533 = vtanh.f32 %v912_v4  ;;  %v1011_v37 = vrot.slane %v912_v4, 4  ;;  %v1166_v4 = vld [vmem:[%s2001_s4 + $0xc0] sm:$0xff] }
 0xfbd   :  { %1535 = vtanh.f32 %v891_v6  ;;  %v1454_v6 = vpack.c.bf16 %v1149_v2, %v1148_v1 }
 0xfc6   :  { %v1534_v5 = vpop.eup %1533 }
 0xfc7   :  { %915 = vrot.lane.b32.xlu0 %v1534_v5, %s1546_s3  ;;  %v1536_v7 = vpop.eup %1535  ;;  %v1167_v5 = vld [vmem:[%s2001_s4 + $0xc8] sm:$0xff] }
 0xfc8   :  { %v895_v8 = vmul.f32 0.5, %v1536_v7  ;;  %v1456_v7 = vpack.c.bf16 %v1167_v5, %v1166_v4 }
 0xfca   :  { %v897_v10 = vadd.f32 0.5, %v895_v8  ;;  %v1150_v8 = vld [vmem:[%s2001_s4 + $0x40] sm:$0xff] }
0x1039   :  { %v916_v11 = vpop.permute.xlu0 %915 }
0x103a   :  { %v918_v12 = vmul.f32 %v916_v11, %v897_v10  ;;  %v1168_v10 = vld [vmem:[%s2001_s4 + $0xd0] sm:$0xff]  ;;  %v1169_v11 = vld [vmem:[%s2001_s4 + $0xd8] sm:$0xff] }
0x103b   :  { %v1460_v13 = vpack.c.bf16 %v1169_v11, %v1168_v10 }
0x103c   :  { %v1034_v15 = vrot.slane %v918_v12, 4  ;;  %v1857_v17 = vsel %vm47_vm0, %v918_v12, %v380_v60  ;;  %1267 = vmatmul.mubr.msk.f32.vlgmr.msra.gmra.mrb[16].mxu0 %vm165_vm1, %v918_v12  ;;  %v1458_v12 = vpack.c.bf16 %v1151_v9, %v1150_v8 }
0x103d   :  { %v1080_v18 = vcombine.low %v1852_v14, %v1857_v17 }
0x103e   :  { %v1036_v20 = vsel %vm47_vm0, %v1760_v58, %v1034_v15  ;;  %v1152_v15 = vld [vmem:[%s2001_s4 + $0x50] sm:$0xff] }
0x103f   :  { %v1053_v52 = vrot.slane %v1036_v20, 4  ;;  %v1153_v20 = vld [vmem:[%s2001_s4 + $0x58] sm:$0xff] }
0x1041   :  { %v1864_v26 = vcombine.low %v1053_v52, %v1056_v25  ;;  %v1170_v25 = vld [vmem:[%s2001_s4 + $0xe0] sm:$0xff]  ;;  %v1171_v52 = vld [vmem:[%s2001_s4 + $0xe8] sm:$0xff] }
0x110f   :  { %v988_v54 = vpop.f32.mrb[16].mxu0 }
0x1110   :  { %v990_v22 = vpop.f32.mrb[17].mxu0  ;;  %v995_v19 = vrot.slane %v988_v54, 4  ;;  %v1462_v54 = vpack.c.bf16 %v1153_v20, %v1152_v15 }
0x1111   :  { %v996_v28 = vrot.slane %v990_v22, 4  ;;  %v1464_v22 = vpack.c.bf16 %v1171_v52, %v1170_v25 }
0x1112   :  { %v999_v3 = vadd.f32 %v995_v19, %v1737_v59  ;;  %v1158_v59 = vld [vmem:[%s2001_s4 + $0x80] sm:$0xff] }
0x1113   :  { %v1867_v29 = vadd.f32 %v996_v28, %v1739_v61  ;;  %v1440_v36 = vpack.c.bf16 %v1159_v35, %v1158_v59  ;;  %v1154_v28 = vld [vmem:[%s2001_s4 + $0x60] sm:$0xff] }
0x1114   :  { %v1001_v21 = vmul.f32 0.5, %v999_v3 }
0x1115   :  { %1537 = vtanh.f32 %v1867_v29  ;;  %1441 = vmatprep.subr.bf16.mxu1 %v1440_v36  ;;  %v1002_v3 = vmul.f32 0.5, %v1867_v29  ;;  %v1172_v29 = vld [vmem:[%s2001_s4 + $0xf0] sm:$0xff] }
0x1116   :  { %1539 = vtanh.f32 %v1001_v21  ;;  %1443 = vmatpush3.bf16.msra.mxu1 %v1442_v41  ;;  %v1468_v40 = vpack.c.bf16 %v1173_v57, %v1172_v29  ;;  %v1156_v41 = vld [vmem:[%s2001_s4 + $0x70] sm:$0xff] }
0x1117   :  { %1445 = vmatprep.subr.bf16.mxu1 %v1444_v43  ;;  %v1157_v43 = vld [vmem:[%s2001_s4 + $0x78] sm:$0xff] }
0x1118   :  { %v1470_v47 = vpack.c.bf16 %v1157_v43, %v1156_v41 }
0x111a   :  { %1447 = vmatpush3.bf16.msra.mxu1 %v1446_v51  ;;  %v1038_v51 = vsel %vm47_vm0, %v1780_v23, %v814_v44 }
0x111b   :  { %1449 = vmatprep.subr.bf16.mxu1 %v1448_v48 }
0x111e   :  { %1451 = vmatpush3.bf16.msra.mxu1 %v1450_v63 }
0x111f   :  { %v1538_v60 = vpop.eup %1537  ;;  %1453 = vmatprep.subr.bf16.mxu1 %v1452_v0 }
0x1120   :  { %1015 = vrot.lane.b32.xlu1 %v1538_v60, %s1546_s3  ;;  %v1540_v58 = vpop.eup %1539  ;;  %v1155_v60 = vld [vmem:[%s2001_s4 + $0x68] sm:$0xff] }
0x1121   :  { %v1005_v27 = vmul.f32 0.5, %v1540_v58  ;;  %v1466_v19 = vpack.c.bf16 %v1155_v60, %v1154_v28  ;;  %v1547_v58 = vmov 1983009808  }
0x1122   :  { %1455 = vmatpush3.bf16.msra.mxu1 %v1454_v6 }
0x1123   :  { %v1007_v30 = vadd.f32 0.5, %v1005_v27  ;;  %1457 = vmatprep.subr.bf16.mxu1 %v1456_v7  ;;  %v1066_v27 = vunpack.c.l.s4 %v1547_v58 }
0x1125   :  { %v1013_v61 = vmul.f32 %v1011_v37, %v1007_v30 }
0x1126   :  { %1459 = vmatpush3.bf16.msra.mxu1 %v1458_v12 }
0x1127   :  { %1461 = vmatprep.subr.bf16.mxu1 %v1460_v13  ;;  %v1268_v13 = vld [vmem:[%s2002_s5] ss:$0 sm:$0xff] }
0x112a   :  { %1463 = vmatpush3.bf16.msra.mxu1 %v1462_v54 }
0x112b   :  { %1465 = vmatprep.subr.bf16.mxu1 %v1464_v22 }
0x112e   :  { %1467 = vmatpush3.bf16.msra.mxu1 %v1466_v19 }
0x112f   :  { %1469 = vmatprep.subr.bf16.mxu1 %v1468_v40 }
0x1132   :  { %1471 = vmatpush3.bf16.msra.mxu1 %v1470_v47 }
0x1192   :  { %v1016_v34 = vpop.permute.xlu1 %1015 }
0x1193   :  { %v1018_v31 = vmul.f32 %v1016_v34, %v1007_v30  ;;  %v1044_v34 = vrot.slane %v1780_v23, 4 }
0x1195   :  { %1020 = vrot.lane.b32.xlu0 %v1018_v31, %s1546_s3  ;;  %v1067_v31 = vunpack.c.0.s8 %v1066_v27  ;;  %v1046_v59 = vsel %vm47_vm0, %v1834_v16, %v1044_v34 }
0x1196   :  { %v1059_v45 = vrot.slane %v1046_v59, 4 }
0x1197   :  { %v1070_v36 = vsub.s32 %v1067_v31, %v1722_v42 }
0x1199   :  { %v1087_v56 = vrot.slane %v1080_v18, %v1070_v36  ;;  %v1079_v0 = vrot.slane %v1864_v26, %v1070_v36 }
0x1207   :  { %v1021_v32 = vpop.permute.xlu0 %1020 }
0x1208   :  { %v1023_v39 = vadd.f32 %v1021_v32, %v1013_v61  ;;  %v1548_v32 = vmov 1934713408  }
0x120a   :  { %1541 = vtanh.f32 %v1023_v39  ;;  %v1099_v39 = vunpack.c.l.s4 %v1548_v32 }
0x120b   :  { %1543 = vtanh.f32 %v1002_v3 }
0x120c   :  { %v1100_v46 = vunpack.c.0.s8 %v1099_v39 }
0x120e   :  { %v1103_v16 = vsub.s32 %v1100_v46, %v1722_v42 }
0x1214   :  { %v1542_v33 = vpop.eup %1541 }
0x1215   :  { %1026 = vrot.lane.b32.xlu1 %v1542_v33, %s1546_s3  ;;  %v1544_v21 = vpop.eup %1543  ;;  %v1049_v33 = vrot.slane %v1744_v24, 4 }
0x1216   :  { %v1006_v30 = vmul.f32 0.5, %v1544_v21 }
0x1218   :  { %v1008_v37 = vadd.f32 0.5, %v1006_v30 }
0x1287   :  { %v1027_v61 = vpop.permute.xlu1 %1026 }
0x1288   :  { %v1029_v35 = vmul.f32 %v1027_v61, %v1008_v37 }
0x128a   :  { %v1031_v38 = vrot.slane %v1029_v35, 4  ;;  %v1051_v55 = vsel %vm47_vm0, %v1029_v35, %v1049_v33 }
0x128b   :  { %v1062_v53 = vrot.slane %v1051_v55, 4 }
0x128c   :  { %v1033_v48 = vsel %vm47_vm0, %v1744_v24, %v1031_v38 }
0x128d   :  { %v1064_v49 = vcombine.low %v1033_v48, %v1038_v51  ;;  %v1088_v50 = vcombine.low %v1059_v45, %v1062_v53 }
0x128f   :  { %v1071_v62 = vrot.slane %v1064_v49, %v1070_v36  ;;  %v1095_v63 = vrot.slane %v1088_v50, %v1070_v36 }
0x1291   :  { %v1096_v1 = vcombine.low %v1071_v62, %v1079_v0  ;;  %v1097_v2 = vcombine.high %v1071_v62, %v1079_v0  ;;  %v1112_v23 = vcombine.low %v1087_v56, %v1095_v63  ;;  %v1113_v44 = vcombine.high %v1087_v56, %v1095_v63 }
0x1293   :  { %v1104_v4 = vrot.slane %v1096_v1, %v1103_v16  ;;  %v1111_v24 = vrot.slane %v1097_v2, %v1103_v16  ;;  %v1120_v5 = vrot.slane %v1112_v23, %v1103_v16  ;;  %v1127_v6 = vrot.slane %v1113_v44, %v1103_v16 }
0x1295   :  { %v1129_v7 = vcombine.high %v1104_v4, %v1120_v5  ;;  %v1131_v8 = vcombine.high %v1111_v24, %v1127_v6  ;;  %v1130_v9 = vcombine.low %v1111_v24, %v1127_v6  ;;  %v1128_v10 = vcombine.low %v1104_v4, %v1120_v5 }
0x1297   :  { %v1476_v14 = vpack.i.bf16 %v1129_v7, %v1131_v8 }
0x1299   :  { %1477 = vrot.lane.b32.xlu0 %v1476_v14, %s1546_s3 }
0x130b   :  { %v1478_v17 = vpop.permute.xlu0 %1477 }
0x130c   :  { %v1480_v18 = vunpack.i.h.bf16 %v1478_v17  ;;  %v1479_v26 = vunpack.i.l.bf16 %v1478_v17 }
0x130e   :  { %v1141_v42 = vsel %vm165_vm1, %v1130_v9, %v1479_v26  ;;  %v1140_v11 = vsel %vm165_vm1, %v1128_v10, %v1480_v18 }
0x130f   :  { %1245 = vmatprep.mubr.f32.mxu1 %v1141_v42 }
0x1310   :  { %1246 = vmatmul.mubr.f32.vlgmr.msra.gmra.mrb[6].mxu1 %v1140_v11 }
0x13e3   :  { %v1301_v12 = vpop.f32.mrb[6].mxu1 }
0x13e4   :  { %v1302_v15 = vpop.f32.mrb[7].mxu1 }
0x13e5   :  { %v1303_v20 = vadd.f32 %v1302_v15, %v1301_v12 }
0x13e7   :  { %v1248_v25 = vadd.f32 %v1303_v20, %v1268_v13 }
0x13e9   :  { %1252 = vst.msk [vmem:[%s2003_s6] sm:$0xff] %vm1251_vm2, %v1248_v25 }

</bundles_post_ra>
